<compile_context>
chip_gen: v7x
topology: tpu7x:2x2x1
jax: 0.10.0
libtpu: 0.0.40
codegen_flags: <defaults>
</compile_context>

<pallas_src>
import jax
import jax.numpy as jnp
from jax.experimental import pallas as pl
from jax.experimental.pallas import tpu as pltpu


def _gradient_kernel(x_ref, out_ref, xp_ref):
    # x_ref  : (TB, 3, H,   W  )  input tile, original dtype (channels 0..2)
    # out_ref: (TB, 3, H+2, W+2)  float32
    # xp_ref : (TB, 3, H+4, W+4)  float32 scratch: zero-padded copy of the tile
    TB, _, H, W = x_ref.shape
    Ho, Wo = H + 2, W + 2

    # Zero only the 2-pixel halo each step (the interior [2:2+H, 2:2+W] is
    # fully overwritten below, so halo zeros from this step are all that is
    # needed; overlapping corner writes are harmless).
    z_rows = jnp.zeros((TB, 3, 2, W + 4), jnp.float32)
    xp_ref[:, :, 0:2, :] = z_rows
    xp_ref[:, :, H + 2:H + 4, :] = z_rows
    z_cols = jnp.zeros((TB, 3, H + 4, 2), jnp.float32)
    xp_ref[:, :, :, 0:2] = z_cols
    xp_ref[:, :, :, W + 2:W + 4] = z_cols

    # Copy the tile into the interior of the padded scratch (f32 cast on VPU).
    xp_ref[:, :, 2:2 + H, 2:2 + W] = x_ref[...].astype(jnp.float32)

    # Shifted-window differences read directly from the scratch ref.
    # vertical kernel  [[0,-1,0],[0,0,0],[0,1,0]]  (cross-correlation, pad=2)
    v = xp_ref[:, :, 2:2 + Ho, 1:1 + Wo] - xp_ref[:, :, 0:Ho, 1:1 + Wo]
    # horizontal kernel [[0,0,0],[-1,0,1],[0,0,0]]
    h = xp_ref[:, :, 1:1 + Ho, 2:2 + Wo] - xp_ref[:, :, 1:1 + Ho, 0:Wo]

    out_ref[...] = jnp.sqrt(v * v + h * h + 1e-6)


def gradient_forward(x, *, batch_tile=None):
    """x: (B, C>=3, H, W) NCHW -> (B, 3, H+2, W+2) float32."""
    B, C, H, W = x.shape
    assert C >= 3, "Gradient module uses channels 0, 1, 2"
    Ho, Wo = H + 2, W + 2
    in_bytes = jnp.dtype(x.dtype).itemsize

    # VMEM capacity of this chip generation with ~15% headroom (v7x: 64 MiB/TC).
    try:
        vmem_cap = int(pltpu.get_tpu_info().vmem_capacity_bytes)
    except Exception:
        vmem_cap = 64 << 20
    vmem_budget = int(vmem_cap * 0.85)

    def step_bytes(tb):
        # double-buffered input + output blocks, plus the padded scratch and
        # roughly one scratch-sized temporary for the shifted-window reads.
        return tb * 3 * (2 * H * W * in_bytes
                         + 2 * Ho * Wo * 4
                         + 2 * (H + 4) * (W + 4) * 4)

    # Pick how many batch elements to process per grid step: enough to get the
    # per-step DMA near ~1 MiB (amortizes per-step overhead for small images),
    # while staying inside the VMEM budget.  Must divide B exactly.
    if batch_tile is None:
        batch_tile = 1
        for tb in range(1, B + 1):
            if B % tb:
                continue
            if step_bytes(tb) > vmem_budget:
                break
            batch_tile = tb
            if tb * 3 * H * W * in_bytes >= (1 << 20):
                break
    TB = batch_tile
    assert B % TB == 0, (B, TB)

    vmem_limit = int(min(max(step_bytes(TB) + (2 << 20), 16 << 20), vmem_budget))

    n_out = B * 3 * Ho * Wo
    cost = pl.CostEstimate(
        flops=int(5 * n_out),                 # 2 sub + 2 mul + 1 add per output
        transcendentals=int(n_out),           # sqrt per output
        bytes_accessed=int(B * 3 * H * W * in_bytes + n_out * 4),
    )

    return pl.pallas_call(
        _gradient_kernel,
        out_shape=jax.ShapeDtypeStruct((B, 3, Ho, Wo), jnp.float32),
        grid_spec=pltpu.PrefetchScalarGridSpec(
            num_scalar_prefetch=0,
            grid=(B // TB,),
            # Channel block index 0 with block size 3 selects channels 0..2 of
            # the raw (B, C, H, W) input -- no wrapper-side slice/cast pass.
            in_specs=[pl.BlockSpec((TB, 3, H, W), lambda b: (b, 0, 0, 0))],
            out_specs=pl.BlockSpec((TB, 3, Ho, Wo), lambda b: (b, 0, 0, 0)),
            scratch_shapes=[pltpu.VMEM((TB, 3, H + 4, W + 4), jnp.float32)],
        ),
        compiler_params=pltpu.CompilerParams(
            dimension_semantics=("parallel",),
            vmem_limit_bytes=vmem_limit),
        cost_estimate=cost,
    )(x)


if __name__ == "__main__":
    key = jax.random.PRNGKey(0)
    B, C, H, W = 2, 4, 16, 16
    x = jax.random.normal(key, (B, C, H, W), dtype=jnp.float32)

    y = gradient_forward(x)
    jax.block_until_ready(y)

    # Pure-JAX reference (identical shifted-difference formulation of the convs)
    Ho, Wo = H + 2, W + 2
    xp = jnp.pad(x[:, :3], ((0, 0), (0, 0), (2, 2), (2, 2)))
    v = xp[:, :, 2:2 + Ho, 1:1 + Wo] - xp[:, :, 0:Ho, 1:1 + Wo]
    h = xp[:, :, 1:1 + Ho, 2:2 + Wo] - xp[:, :, 1:1 + Ho, 0:Wo]
    ref = jnp.sqrt(v * v + h * h + 1e-6)

    assert y.shape == (B, 3, Ho, Wo), y.shape
    assert y.dtype == jnp.float32
    assert jnp.allclose(y, ref, rtol=1e-5, atol=1e-5), float(jnp.max(jnp.abs(y - ref)))
    print("KERNEL_OK")
</pallas_src>

<mosaic_0001>
module attributes {stable_mosaic.version = 11 : i64} {
  func.func @_gradient_kernel(%arg0: i32, %arg1: memref<2x3x16x16xf32, #tpu.memory_space<vmem>>, %arg2: memref<2x3x18x18xf32, #tpu.memory_space<vmem>>, %arg3: memref<2x3x20x20xf32, #tpu.memory_space<vmem>>) attributes {dimension_semantics = [#tpu.dimension_semantics<parallel>], iteration_bounds = array<i64: 1>, scalar_prefetch = 0 : i64, scratch_operands = 1 : i64, tpu.core_type = #tpu.core_type<tc>, window_params = [{transform_indices = @transform_0, window_bounds = array<i64: 2, 3, 16, 16>}, {transform_indices = @transform_1, window_bounds = array<i64: 2, 3, 18, 18>}]} {
    %cst = arith.constant 0.000000e+00 : f32
    %0 = vector.broadcast %cst : f32 to vector<2x3x2x20xf32>
    %c0 = arith.constant 0 : index
    %c0_0 = arith.constant 0 : index
    %c0_1 = arith.constant 0 : index
    %c0_2 = arith.constant 0 : index
    %1 = vector.load %arg3[%c0, %c0_0, %c0_1, %c0_2] : memref<2x3x20x20xf32, #tpu.memory_space<vmem>>, vector<2x3x2x20xf32>
    tpu.vector_store %arg3[%c0, %c0_0, %c0_1, %c0_2], %0 {strides = array<i32>} : memref<2x3x20x20xf32, #tpu.memory_space<vmem>>, vector<2x3x2x20xf32>,
    %c0_3 = arith.constant 0 : index
    %c0_4 = arith.constant 0 : index
    %c18 = arith.constant 18 : index
    %c0_5 = arith.constant 0 : index
    %2 = vector.load %arg3[%c0_3, %c0_4, %c18, %c0_5] : memref<2x3x20x20xf32, #tpu.memory_space<vmem>>, vector<2x3x2x20xf32>
    tpu.vector_store %arg3[%c0_3, %c0_4, %c18, %c0_5], %0 {strides = array<i32>} : memref<2x3x20x20xf32, #tpu.memory_space<vmem>>, vector<2x3x2x20xf32>,
    %cst_6 = arith.constant 0.000000e+00 : f32
    %3 = vector.broadcast %cst_6 : f32 to vector<2x3x20x2xf32>
    %c0_7 = arith.constant 0 : index
    %c0_8 = arith.constant 0 : index
    %c0_9 = arith.constant 0 : index
    %c0_10 = arith.constant 0 : index
    %4 = vector.load %arg3[%c0_7, %c0_8, %c0_9, %c0_10] : memref<2x3x20x20xf32, #tpu.memory_space<vmem>>, vector<2x3x20x2xf32>
    tpu.vector_store %arg3[%c0_7, %c0_8, %c0_9, %c0_10], %3 {strides = array<i32>} : memref<2x3x20x20xf32, #tpu.memory_space<vmem>>, vector<2x3x20x2xf32>,
    %c0_11 = arith.constant 0 : index
    %c0_12 = arith.constant 0 : index
    %c0_13 = arith.constant 0 : index
    %c18_14 = arith.constant 18 : index
    %5 = vector.load %arg3[%c0_11, %c0_12, %c0_13, %c18_14] : memref<2x3x20x20xf32, #tpu.memory_space<vmem>>, vector<2x3x20x2xf32>
    tpu.vector_store %arg3[%c0_11, %c0_12, %c0_13, %c18_14], %3 {strides = array<i32>} : memref<2x3x20x20xf32, #tpu.memory_space<vmem>>, vector<2x3x20x2xf32>,
    %c0_15 = arith.constant 0 : index
    %c0_16 = arith.constant 0 : index
    %c0_17 = arith.constant 0 : index
    %c0_18 = arith.constant 0 : index
    %6 = vector.load %arg1[%c0_15, %c0_16, %c0_17, %c0_18] : memref<2x3x16x16xf32, #tpu.memory_space<vmem>>, vector<2x3x16x16xf32>
    %c0_19 = arith.constant 0 : index
    %c0_20 = arith.constant 0 : index
    %c2 = arith.constant 2 : index
    %c2_21 = arith.constant 2 : index
    %7 = vector.load %arg3[%c0_19, %c0_20, %c2, %c2_21] : memref<2x3x20x20xf32, #tpu.memory_space<vmem>>, vector<2x3x16x16xf32>
    tpu.vector_store %arg3[%c0_19, %c0_20, %c2, %c2_21], %6 {strides = array<i32>} : memref<2x3x20x20xf32, #tpu.memory_space<vmem>>, vector<2x3x16x16xf32>,
    %c0_22 = arith.constant 0 : index
    %c0_23 = arith.constant 0 : index
    %c2_24 = arith.constant 2 : index
    %c1 = arith.constant 1 : index
    %8 = vector.load %arg3[%c0_22, %c0_23, %c2_24, %c1] : memref<2x3x20x20xf32, #tpu.memory_space<vmem>>, vector<2x3x18x18xf32>
    %c0_25 = arith.constant 0 : index
    %c0_26 = arith.constant 0 : index
    %c0_27 = arith.constant 0 : index
    %c1_28 = arith.constant 1 : index
    %9 = vector.load %arg3[%c0_25, %c0_26, %c0_27, %c1_28] : memref<2x3x20x20xf32, #tpu.memory_space<vmem>>, vector<2x3x18x18xf32>
    %10 = arith.subf %8, %9 : vector<2x3x18x18xf32>
    %c0_29 = arith.constant 0 : index
    %c0_30 = arith.constant 0 : index
    %c1_31 = arith.constant 1 : index
    %c2_32 = arith.constant 2 : index
    %11 = vector.load %arg3[%c0_29, %c0_30, %c1_31, %c2_32] : memref<2x3x20x20xf32, #tpu.memory_space<vmem>>, vector<2x3x18x18xf32>
    %c0_33 = arith.constant 0 : index
    %c0_34 = arith.constant 0 : index
    %c1_35 = arith.constant 1 : index
    %c0_36 = arith.constant 0 : index
    %12 = vector.load %arg3[%c0_33, %c0_34, %c1_35, %c0_36] : memref<2x3x20x20xf32, #tpu.memory_space<vmem>>, vector<2x3x18x18xf32>
    %13 = arith.subf %11, %12 : vector<2x3x18x18xf32>
    %14 = arith.mulf %10, %10 : vector<2x3x18x18xf32>
    %15 = arith.mulf %13, %13 : vector<2x3x18x18xf32>
    %16 = arith.addf %14, %15 : vector<2x3x18x18xf32>
    %cst_37 = arith.constant 9.99999997E-7 : f32
    %17 = vector.broadcast %cst_37 : f32 to vector<2x3x18x18xf32>
    %18 = arith.addf %16, %17 : vector<2x3x18x18xf32>
    %19 = math.sqrt %18 : vector<2x3x18x18xf32>
    %c0_38 = arith.constant 0 : index
    %c0_39 = arith.constant 0 : index
    %c0_40 = arith.constant 0 : index
    %c0_41 = arith.constant 0 : index
    %20 = vector.load %arg2[%c0_38, %c0_39, %c0_40, %c0_41] : memref<2x3x18x18xf32, #tpu.memory_space<vmem>>, vector<2x3x18x18xf32>
    tpu.vector_store %arg2[%c0_38, %c0_39, %c0_40, %c0_41], %19 {strides = array<i32>} : memref<2x3x18x18xf32, #tpu.memory_space<vmem>>, vector<2x3x18x18xf32>,
    return
  }
  func.func @transform_0(%arg0: i32) -> (i32, i32, i32, i32) {
    %c0_i32 = arith.constant 0 : i32
    %c0_i32_0 = arith.constant 0 : i32
    %c0_i32_1 = arith.constant 0 : i32
    %c0_i32_2 = arith.constant 0 : i32
    return %arg0, %c0_i32, %c0_i32_0, %c0_i32_1 : i32, i32, i32, i32
  }
  func.func @transform_1(%arg0: i32) -> (i32, i32, i32, i32) {
    %c0_i32 = arith.constant 0 : i32
    %c0_i32_0 = arith.constant 0 : i32
    %c0_i32_1 = arith.constant 0 : i32
    %c0_i32_2 = arith.constant 0 : i32
    return %arg0, %c0_i32, %c0_i32_0, %c0_i32_1 : i32, i32, i32, i32
  }
}

</mosaic_0001>

<bundles_post_ra>
// kernel: tpu_custom_call.1
= control target key start
LH: loop header
LB: loop body
LE: loop exit
PB: predicated region body
PF: predicated region fallthrough
CT: control target
= control target key end

     0   :  { %6 = vsyncpa [#allocation4], 0  ;;  %s1192_s0 = inlined_call_operand.hbm [shape: f32[2,4,16,16], index: 0, kind: input, shape index: {}]   ;;  %s1193_s1 = inlined_call_operand.vmem [shape: f32[2,3,18,18], index: 1, kind: output, shape index: {}]  }
   0x1   :  { %s16_s6 = sld [smem:[#allocation0]]   ;;  %s753_s7 = smov [#allocation3]  }
   0x2   :  { %s24_s8 = sshll.u32 %s753_s7, 4  ;;  %s754_s9 = smov 1024   ;;  %s25_s8 = int_to_ptr.vmem [resolvable:$true] %s24_s8 }
   0x3   :  { %31 = sst [smem:[#allocation6]] %s754_s9  ;;  %s755_s10 = smov 768  }
   0x4   :  { %33 = sst [smem:[#allocation6 + $0x1]] %s755_s10  ;;  %s756_s11 = smov 6  }
   0x5   :  { %35 = sst [smem:[#allocation6 + $0x2]] %s756_s11  ;;  %s757_s13 = smov 128  }
   0x6   :  { %37 = sst [smem:[#allocation6 + $0x3]] %s757_s13  ;;  %s758_s15 = smov 8  }
   0x7   :  { %s702_s12 = sshll.u32 %s16_s6, 26  ;;  %39 = sst [smem:[#allocation6 + $0x4]] %s757_s13 }
   0x8   :  { %s703_s14 = sadd.s32 134217728, %s702_s12  ;;  %41 = sst [smem:[#allocation6 + $0x5]] %s758_s15 }
   0x9   :  { %s759_s16 = smov [#allocation4]   ;;  %s760_s17 = smov [#allocation5]  }
   0xa   :  { %43 = dma.general %s1192_s0, 1536, %s25_s8, %s759_s16, %s760_s17, [#allocation6], %s703_s14, 0  }
   0xb   :  { %751 = dma.done.wait [#allocation4], 1536  }
   0xc   :  { %752 = vsyncadd [#allocation4], 4294965760  ;;  %vm47_vm0 = vcmask 156672   ;;  %vm60_vm1 = vcmask 15360   ;;  %vm80_vm2 = vcmask 162960   ;;  %v761_v0 = vmov 0.0  }
   0xd   :  { %48 = vst.msk [vmem:[#allocation2] sm:$0x3] %vm47_vm0, %v761_v0  ;;  %49 = vst.msk [vmem:[#allocation2 + $0x18] sm:$0x3] %vm47_vm0, %v761_v0  ;;  %vm63_vm3 = vcmask 11264   ;;  %vm83_vm4 = vcmask 158864  }
   0xe   :  { %62 = vst.msk [vmem:[#allocation2 + $0x8] sm:$0xff] %vm60_vm1, %v761_v0  ;;  %66 = vst.msk [vmem:[#allocation2 + $0x20] sm:$0xff] %vm60_vm1, %v761_v0  ;;  %v100_v1 = vld [vmem:[#allocation3] sm:$0xff]  ;;  %v102_v2 = vld [vmem:[#allocation3 + $0x10] sm:$0xff]  ;;  %s762_s0 = smov 2   ;;  %vm160_vm5 = vcmask 146448  }
   0xf   :  { %50 = vst.msk [vmem:[#allocation2 + $0x30] sm:$0x3] %vm47_vm0, %v761_v0  ;;  %51 = vst.msk [vmem:[#allocation2 + $0x48] sm:$0x3] %vm47_vm0, %v761_v0  ;;  %124 = vrot.lane.b32.xlu0 %v100_v1, %s762_s0  ;;  %128 = vrot.lane.b32.xlu1 %v102_v2, %s762_s0  ;;  %v101_v3 = vld [vmem:[#allocation3 + $0x8] sm:$0xff]  ;;  %v103_v4 = vld [vmem:[#allocation3 + $0x18] sm:$0xff] }
  0x10   :  { %52 = vst.msk [vmem:[#allocation2 + $0x60] sm:$0x3] %vm47_vm0, %v761_v0  ;;  %53 = vst.msk [vmem:[#allocation2 + $0x78] sm:$0x3] %vm47_vm0, %v761_v0  ;;  %v104_v5 = vld [vmem:[#allocation3 + $0x20] sm:$0xff]  ;;  %v105_v6 = vld [vmem:[#allocation3 + $0x28] sm:$0xff] }
  0x11   :  { %54 = vst.msk [vmem:[#allocation2 + $0x12] sm:$0x3] %vm47_vm0, %v761_v0  ;;  %55 = vst.msk [vmem:[#allocation2 + $0x2a] sm:$0x3] %vm47_vm0, %v761_v0  ;;  %v107_v7 = vld [vmem:[#allocation3 + $0x38] sm:$0xff]  ;;  %v106_v8 = vld [vmem:[#allocation3 + $0x30] sm:$0xff] }
  0x12   :  { %56 = vst.msk [vmem:[#allocation2 + $0x42] sm:$0x3] %vm47_vm0, %v761_v0  ;;  %57 = vst.msk [vmem:[#allocation2 + $0x5a] sm:$0x3] %vm47_vm0, %v761_v0  ;;  %v108_v9 = vld [vmem:[#allocation3 + $0x40] sm:$0xff]  ;;  %v109_v10 = vld [vmem:[#allocation3 + $0x48] sm:$0xff] }
  0x13   :  { %58 = vst.msk [vmem:[#allocation2 + $0x72] sm:$0x3] %vm47_vm0, %v761_v0  ;;  %59 = vst.msk [vmem:[#allocation2 + $0x8a] sm:$0x3] %vm47_vm0, %v761_v0  ;;  %126 = vrot.lane.b32.xlu0 %v101_v3, %s762_s0  ;;  %130 = vrot.lane.b32.xlu1 %v103_v4, %s762_s0  ;;  %v111_v11 = vld [vmem:[#allocation3 + $0x58] sm:$0xff]  ;;  %v110_v12 = vld [vmem:[#allocation3 + $0x50] sm:$0xff] }
  0x14   :  { %69 = vst.msk [vmem:[#allocation2 + $0x38] sm:$0xff] %vm60_vm1, %v761_v0  ;;  %72 = vst.msk [vmem:[#allocation2 + $0x50] sm:$0xff] %vm60_vm1, %v761_v0  ;;  %s763_s20 = smov 127  }
  0x15   :  { %75 = vst.msk [vmem:[#allocation2 + $0x68] sm:$0xff] %vm60_vm1, %v761_v0  ;;  %78 = vst.msk [vmem:[#allocation2 + $0x80] sm:$0xff] %vm60_vm1, %v761_v0 }
  0x16   :  { %61 = vst.msk [vmem:[#allocation2] sm:$0xff] %vm60_vm1, %v761_v0  ;;  %65 = vst.msk [vmem:[#allocation2 + $0x18] sm:$0xff] %vm60_vm1, %v761_v0 }
  0x17   :  { %82 = vst.msk [vmem:[#allocation2 + $0x8] sm:$0xff] %vm80_vm2, %v761_v0  ;;  %86 = vst.msk [vmem:[#allocation2 + $0x20] sm:$0xff] %vm80_vm2, %v761_v0  ;;  %132 = vrot.lane.b32.xlu0 %v104_v5, %s762_s0  ;;  %134 = vrot.lane.b32.xlu1 %v105_v6, %s762_s0 }
  0x18   :  { %68 = vst.msk [vmem:[#allocation2 + $0x30] sm:$0xff] %vm60_vm1, %v761_v0  ;;  %71 = vst.msk [vmem:[#allocation2 + $0x48] sm:$0xff] %vm60_vm1, %v761_v0 }
  0x19   :  { %74 = vst.msk [vmem:[#allocation2 + $0x60] sm:$0xff] %vm60_vm1, %v761_v0  ;;  %77 = vst.msk [vmem:[#allocation2 + $0x78] sm:$0xff] %vm60_vm1, %v761_v0 }
  0x1a   :  { %89 = vst.msk [vmem:[#allocation2 + $0x38] sm:$0xff] %vm80_vm2, %v761_v0  ;;  %92 = vst.msk [vmem:[#allocation2 + $0x50] sm:$0xff] %vm80_vm2, %v761_v0 }
  0x1b   :  { %95 = vst.msk [vmem:[#allocation2 + $0x68] sm:$0xff] %vm80_vm2, %v761_v0  ;;  %98 = vst.msk [vmem:[#allocation2 + $0x80] sm:$0xff] %vm80_vm2, %v761_v0  ;;  %138 = vrot.lane.b32.xlu1 %v107_v7, %s762_s0  ;;  %136 = vrot.lane.b32.xlu0 %v106_v8, %s762_s0 }
  0x1c   :  { %64 = vst.msk [vmem:[#allocation2 + $0x10] sm:$0xf] %vm63_vm3, %v761_v0  ;;  %67 = vst.msk [vmem:[#allocation2 + $0x28] sm:$0xf] %vm63_vm3, %v761_v0 }
  0x1d   :  { %70 = vst.msk [vmem:[#allocation2 + $0x40] sm:$0xf] %vm63_vm3, %v761_v0  ;;  %73 = vst.msk [vmem:[#allocation2 + $0x58] sm:$0xf] %vm63_vm3, %v761_v0 }
  0x1e   :  { %76 = vst.msk [vmem:[#allocation2 + $0x70] sm:$0xf] %vm63_vm3, %v761_v0  ;;  %79 = vst.msk [vmem:[#allocation2 + $0x88] sm:$0xf] %vm63_vm3, %v761_v0 }
  0x1f   :  { %81 = vst.msk [vmem:[#allocation2] sm:$0xff] %vm80_vm2, %v761_v0  ;;  %85 = vst.msk [vmem:[#allocation2 + $0x18] sm:$0xff] %vm80_vm2, %v761_v0  ;;  %140 = vrot.lane.b32.xlu0 %v108_v9, %s762_s0  ;;  %142 = vrot.lane.b32.xlu1 %v109_v10, %s762_s0 }
  0x20   :  { %84 = vst.msk [vmem:[#allocation2 + $0x10] sm:$0xf] %vm83_vm4, %v761_v0  ;;  %87 = vst.msk [vmem:[#allocation2 + $0x28] sm:$0xf] %vm83_vm4, %v761_v0 }
  0x21   :  { %88 = vst.msk [vmem:[#allocation2 + $0x30] sm:$0xff] %vm80_vm2, %v761_v0  ;;  %91 = vst.msk [vmem:[#allocation2 + $0x48] sm:$0xff] %vm80_vm2, %v761_v0 }
  0x22   :  { %94 = vst.msk [vmem:[#allocation2 + $0x60] sm:$0xff] %vm80_vm2, %v761_v0  ;;  %97 = vst.msk [vmem:[#allocation2 + $0x78] sm:$0xff] %vm80_vm2, %v761_v0 }
  0x23   :  { %90 = vst.msk [vmem:[#allocation2 + $0x40] sm:$0xf] %vm83_vm4, %v761_v0  ;;  %93 = vst.msk [vmem:[#allocation2 + $0x58] sm:$0xf] %vm83_vm4, %v761_v0  ;;  %146 = vrot.lane.b32.xlu1 %v111_v11, %s762_s0  ;;  %144 = vrot.lane.b32.xlu0 %v110_v12, %s762_s0 }
  0x24   :  { %96 = vst.msk [vmem:[#allocation2 + $0x70] sm:$0xf] %vm83_vm4, %v761_v0  ;;  %99 = vst.msk [vmem:[#allocation2 + $0x88] sm:$0xf] %vm83_vm4, %v761_v0 }
  0x81   :  { %v125_v13 = vpop.permute.xlu0 %124  ;;  %v129_v14 = vpop.permute.xlu1 %128 }
  0x82   :  { %161 = vst.msk [vmem:[#allocation2 + $0x2] sm:$0xff] %vm160_vm5, %v125_v13  ;;  %163 = vst.msk [vmem:[#allocation2 + $0x1a] sm:$0xff] %vm160_vm5, %v129_v14 }
  0x85   :  { %v127_v15 = vpop.permute.xlu0 %126  ;;  %v131_v16 = vpop.permute.xlu1 %130 }
  0x86   :  { %162 = vst.msk [vmem:[#allocation2 + $0xa] sm:$0xff] %vm160_vm5, %v127_v15  ;;  %164 = vst.msk [vmem:[#allocation2 + $0x22] sm:$0xff] %vm160_vm5, %v131_v16 }
  0x89   :  { %v227_v17 = vld [vmem:[#allocation2 + $0x1] sm:$0xff]  ;;  %v133_v18 = vpop.permute.xlu0 %132  ;;  %v135_v19 = vpop.permute.xlu1 %134  ;;  %v230_v24 = vld [vmem:[#allocation2 + $0x19] sm:$0xff] }
  0x8a   :  { %263 = vrot.lane.b32.xlu0 %v227_v17, %s762_s0  ;;  %165 = vst.msk [vmem:[#allocation2 + $0x32] sm:$0xff] %vm160_vm5, %v133_v18  ;;  %166 = vst.msk [vmem:[#allocation2 + $0x3a] sm:$0xff] %vm160_vm5, %v135_v19 }
  0x8d   :  { %v228_v20 = vld [vmem:[#allocation2 + $0x9] sm:$0xff]  ;;  %v229_v21 = vld [vmem:[#allocation2 + $0x11] sm:$0x3]  ;;  %v139_v22 = vpop.permute.xlu1 %138  ;;  %v137_v23 = vpop.permute.xlu0 %136  ;;  %v231_v25 = vld [vmem:[#allocation2 + $0x21] sm:$0xff] }
  0x8e   :  { %265 = vrot.lane.b32.xlu1 %v228_v20, %s762_s0  ;;  %267 = vrot.lane.b32.xlu0 %v229_v21, %s762_s0  ;;  %168 = vst.msk [vmem:[#allocation2 + $0x52] sm:$0xff] %vm160_vm5, %v139_v22  ;;  %167 = vst.msk [vmem:[#allocation2 + $0x4a] sm:$0xff] %vm160_vm5, %v137_v23  ;;  %v232_v28 = vld [vmem:[#allocation2 + $0x29] sm:$0x3] }
  0x91   :  { %v141_v26 = vpop.permute.xlu0 %140  ;;  %v143_v27 = vpop.permute.xlu1 %142  ;;  %v233_v29 = vld [vmem:[#allocation2 + $0x31] sm:$0xff]  ;;  %v234_v32 = vld [vmem:[#allocation2 + $0x39] sm:$0xff]  ;;  %v235_v33 = vld [vmem:[#allocation2 + $0x41] sm:$0x3] }
  0x92   :  { %269 = vrot.lane.b32.xlu1 %v230_v24, %s762_s0  ;;  %271 = vrot.lane.b32.xlu0 %v231_v25, %s762_s0  ;;  %169 = vst.msk [vmem:[#allocation2 + $0x62] sm:$0xff] %vm160_vm5, %v141_v26  ;;  %170 = vst.msk [vmem:[#allocation2 + $0x6a] sm:$0xff] %vm160_vm5, %v143_v27 }
  0x95   :  { %v147_v30 = vpop.permute.xlu1 %146  ;;  %v145_v31 = vpop.permute.xlu0 %144  ;;  %v236_v34 = vld [vmem:[#allocation2 + $0x49] sm:$0xff]  ;;  %v237_v35 = vld [vmem:[#allocation2 + $0x51] sm:$0xff]  ;;  %v238_v36 = vld [vmem:[#allocation2 + $0x59] sm:$0x3] }
  0x96   :  { %273 = vrot.lane.b32.xlu1 %v232_v28, %s762_s0  ;;  %275 = vrot.lane.b32.xlu0 %v233_v29, %s762_s0  ;;  %172 = vst.msk [vmem:[#allocation2 + $0x82] sm:$0xff] %vm160_vm5, %v147_v30  ;;  %171 = vst.msk [vmem:[#allocation2 + $0x7a] sm:$0xff] %vm160_vm5, %v145_v31 }
  0x99   :  { %v239_v37 = vld [vmem:[#allocation2 + $0x61] sm:$0xff]  ;;  %v862_v38 = vld [vmem:[#allocation2 + $0x69] sm:$0xff]  ;;  %v864_v39 = vld [vmem:[#allocation2 + $0x71] sm:$0x3] }
  0x9a   :  { %277 = vrot.lane.b32.xlu1 %v234_v32, %s762_s0  ;;  %279 = vrot.lane.b32.xlu0 %v235_v33, %s762_s0 }
  0x9d   :  { %v870_v40 = vld [vmem:[#allocation2 + $0x79] sm:$0xff]  ;;  %v872_v41 = vld [vmem:[#allocation2 + $0x81] sm:$0xff]  ;;  %v878_v42 = vld [vmem:[#allocation2 + $0x89] sm:$0x3] }
  0x9e   :  { %281 = vrot.lane.b32.xlu1 %v236_v34, %s762_s0  ;;  %283 = vrot.lane.b32.xlu0 %v237_v35, %s762_s0 }
  0xa2   :  { %285 = vrot.lane.b32.xlu1 %v238_v36, %s762_s0  ;;  %287 = vrot.lane.b32.xlu0 %v239_v37, %s762_s0 }
  0xa6   :  { %289 = vrot.lane.b32.xlu1 %v862_v38, %s762_s0  ;;  %291 = vrot.lane.b32.xlu0 %v864_v39, %s762_s0 }
  0xaa   :  { %293 = vrot.lane.b32.xlu1 %v870_v40, %s762_s0  ;;  %295 = vrot.lane.b32.xlu0 %v872_v41, %s762_s0 }
  0xae   :  { %297 = vrot.lane.b32.xlu1 %v878_v42, %s762_s0 }
  0xfc   :  { %v264_v43 = vpop.permute.xlu0 %263 }
  0xfd   :  { %v317_v44 = vsub.f32 %v227_v17, %v264_v43  ;;  %v177_v43 = vld [vmem:[#allocation2 + $0x22] sm:$0xff] }
  0xff   :  { %v353_v45 = vmul.f32 %v317_v44, %v317_v44  ;;  %v178_v44 = vld [vmem:[#allocation2 + $0x2a] sm:$0x3] }
 0x100   :  { %v266_v46 = vpop.permute.xlu1 %265  ;;  %v268_v47 = vpop.permute.xlu0 %267 }
 0x101   :  { %v318_v48 = vsub.f32 %v228_v20, %v266_v46  ;;  %v319_v49 = vsub.f32 %v229_v21, %v268_v47  ;;  %389 = vrot.lane.b32.xlu0 %v353_v45, %s763_s20  ;;  %v195_v45 = vld [vmem:[#allocation2 + $0x20] sm:$0xff]  ;;  %v179_v46 = vld [vmem:[#allocation2 + $0x32] sm:$0xff] }
 0x103   :  { %v354_v50 = vmul.f32 %v318_v48, %v318_v48  ;;  %v355_v51 = vmul.f32 %v319_v49, %v319_v49 }
 0x104   :  { %v270_v52 = vpop.permute.xlu1 %269  ;;  %v272_v53 = vpop.permute.xlu0 %271 }
 0x105   :  { %v320_v54 = vsub.f32 %v230_v24, %v270_v52  ;;  %v321_v55 = vsub.f32 %v231_v25, %v272_v53  ;;  %391 = vrot.lane.b32.xlu1 %v354_v50, %s763_s20  ;;  %393 = vrot.lane.b32.xlu0 %v355_v51, %s763_s20  ;;  %v197_v50 = vld [vmem:[#allocation2 + $0x30] sm:$0xff]  ;;  %v180_v51 = vld [vmem:[#allocation2 + $0x3a] sm:$0xff] }
 0x106   :  { %v198_v52 = vld [vmem:[#allocation2 + $0x38] sm:$0xff] }
 0x107   :  { %v356_v56 = vmul.f32 %v320_v54, %v320_v54  ;;  %v357_v57 = vmul.f32 %v321_v55, %v321_v55 }
 0x108   :  { %v274_v58 = vpop.permute.xlu1 %273  ;;  %v276_v59 = vpop.permute.xlu0 %275 }
 0x109   :  { %v322_v60 = vsub.f32 %v232_v28, %v274_v58  ;;  %v323_v61 = vsub.f32 %v233_v29, %v276_v59  ;;  %395 = vrot.lane.b32.xlu1 %v356_v56, %s763_s20  ;;  %397 = vrot.lane.b32.xlu0 %v357_v57, %s763_s20  ;;  %v213_v56 = vsub.f32 %v177_v43, %v195_v45  ;;  %v181_v57 = vld [vmem:[#allocation2 + $0x42] sm:$0x3] }
 0x10a   :  { %v215_v59 = vsub.f32 %v179_v46, %v197_v50 }
 0x10b   :  { %v358_v62 = vmul.f32 %v322_v60, %v322_v60  ;;  %v359_v63 = vmul.f32 %v323_v61, %v323_v61  ;;  %v216_v60 = vsub.f32 %v180_v51, %v198_v52  ;;  %v199_v61 = vld [vmem:[#allocation2 + $0x40] sm:$0x3] }
 0x10c   :  { %v278_v0 = vpop.permute.xlu1 %277  ;;  %v280_v1 = vpop.permute.xlu0 %279 }
 0x10d   :  { %v324_v2 = vsub.f32 %v234_v32, %v278_v0  ;;  %v325_v3 = vsub.f32 %v235_v33, %v280_v1  ;;  %399 = vrot.lane.b32.xlu1 %v358_v62, %s763_s20  ;;  %401 = vrot.lane.b32.xlu0 %v359_v63, %s763_s20  ;;  %v173_v33 = vld [vmem:[#allocation2 + $0x2] sm:$0xff]  ;;  %v182_v62 = vld [vmem:[#allocation2 + $0x4a] sm:$0xff] }
 0x10e   :  { %v200_v63 = vld [vmem:[#allocation2 + $0x48] sm:$0xff] }
 0x10f   :  { %v360_v4 = vmul.f32 %v324_v2, %v324_v2  ;;  %v361_v5 = vmul.f32 %v325_v3, %v325_v3  ;;  %v183_v3 = vld [vmem:[#allocation2 + $0x52] sm:$0xff] }
 0x110   :  { %v282_v6 = vpop.permute.xlu1 %281  ;;  %v284_v7 = vpop.permute.xlu0 %283 }
 0x111   :  { %v326_v8 = vsub.f32 %v236_v34, %v282_v6  ;;  %v327_v9 = vsub.f32 %v237_v35, %v284_v7  ;;  %403 = vrot.lane.b32.xlu1 %v360_v4, %s763_s20  ;;  %405 = vrot.lane.b32.xlu0 %v361_v5, %s763_s20  ;;  %v191_v34 = vld [vmem:[#allocation2] sm:$0xff]  ;;  %v201_v4 = vld [vmem:[#allocation2 + $0x50] sm:$0xff]  ;;  %v184_v5 = vld [vmem:[#allocation2 + $0x5a] sm:$0x3] }
 0x112   :  { %v209_v35 = vsub.f32 %v173_v33, %v191_v34  ;;  %v202_v6 = vld [vmem:[#allocation2 + $0x58] sm:$0x3]  ;;  %v187_v7 = vld [vmem:[#allocation2 + $0x72] sm:$0x3] }
 0x113   :  { %v362_v10 = vmul.f32 %v326_v8, %v326_v8  ;;  %v363_v11 = vmul.f32 %v327_v9, %v327_v9 }
 0x114   :  { %v286_v12 = vpop.permute.xlu1 %285  ;;  %v288_v13 = vpop.permute.xlu0 %287  ;;  %v335_v47 = vmul.f32 %v209_v35, %v209_v35  ;;  %v220_v35 = vsub.f32 %v184_v5, %v202_v6 }
 0x115   :  { %v328_v14 = vsub.f32 %v238_v36, %v286_v12  ;;  %v329_v15 = vsub.f32 %v239_v37, %v288_v13  ;;  %407 = vrot.lane.b32.xlu1 %v362_v10, %s763_s20  ;;  %409 = vrot.lane.b32.xlu0 %v363_v11, %s763_s20  ;;  %v175_v36 = vld [vmem:[#allocation2 + $0x12] sm:$0x3]  ;;  %v174_v37 = vld [vmem:[#allocation2 + $0xa] sm:$0xff]  ;;  %v185_v11 = vld [vmem:[#allocation2 + $0x62] sm:$0xff] }
 0x116   :  { %v203_v12 = vld [vmem:[#allocation2 + $0x60] sm:$0xff]  ;;  %v186_v13 = vld [vmem:[#allocation2 + $0x6a] sm:$0xff]  ;;  %v918_v51 = vmul.f32 %v220_v35, %v220_v35 }
 0x117   :  { %v364_v16 = vmul.f32 %v328_v14, %v328_v14  ;;  %v365_v17 = vmul.f32 %v329_v15, %v329_v15 }
 0x118   :  { %v290_v18 = vpop.permute.xlu1 %289  ;;  %v292_v19 = vpop.permute.xlu0 %291 }
 0x119   :  { %v330_v20 = vsub.f32 %v862_v38, %v290_v18  ;;  %v331_v21 = vsub.f32 %v864_v39, %v292_v19  ;;  %411 = vrot.lane.b32.xlu1 %v364_v16, %s763_s20  ;;  %413 = vrot.lane.b32.xlu0 %v365_v17, %s763_s20  ;;  %v192_v38 = vld [vmem:[#allocation2 + $0x8] sm:$0xff]  ;;  %v193_v39 = vld [vmem:[#allocation2 + $0x10] sm:$0x3]  ;;  %v339_v16 = vmul.f32 %v213_v56, %v213_v56  ;;  %v188_v19 = vld [vmem:[#allocation2 + $0x7a] sm:$0xff] }
 0x11a   :  { %v210_v48 = vsub.f32 %v174_v37, %v192_v38  ;;  %v211_v49 = vsub.f32 %v175_v36, %v193_v39  ;;  %v204_v17 = vld [vmem:[#allocation2 + $0x68] sm:$0xff]  ;;  %v205_v18 = vld [vmem:[#allocation2 + $0x70] sm:$0x3]  ;;  %v221_v36 = vsub.f32 %v185_v11, %v203_v12 }
 0x11b   :  { %v366_v22 = vmul.f32 %v330_v20, %v330_v20  ;;  %v367_v23 = vmul.f32 %v331_v21, %v331_v21  ;;  %v190_v20 = vld [vmem:[#allocation2 + $0x8a] sm:$0x3]  ;;  %v222_v37 = vsub.f32 %v186_v13, %v204_v17  ;;  %v223_v38 = vsub.f32 %v187_v7, %v205_v18 }
 0x11c   :  { %v294_v24 = vpop.permute.xlu1 %293  ;;  %v296_v25 = vpop.permute.xlu0 %295  ;;  %v336_v1 = vmul.f32 %v210_v48, %v210_v48  ;;  %v337_v2 = vmul.f32 %v211_v49, %v211_v49  ;;  %v920_v52 = vmul.f32 %v221_v36, %v221_v36 }
 0x11d   :  { %v332_v26 = vsub.f32 %v870_v40, %v294_v24  ;;  %v333_v27 = vsub.f32 %v872_v41, %v296_v25  ;;  %415 = vrot.lane.b32.xlu1 %v366_v22, %s763_s20  ;;  %417 = vrot.lane.b32.xlu0 %v367_v23, %s763_s20  ;;  %v176_v40 = vld [vmem:[#allocation2 + $0x1a] sm:$0xff]  ;;  %v341_v22 = vmul.f32 %v215_v59, %v215_v59 }
 0x11e   :  { %v194_v41 = vld [vmem:[#allocation2 + $0x18] sm:$0xff]  ;;  %v342_v23 = vmul.f32 %v216_v60, %v216_v60  ;;  %v217_v24 = vsub.f32 %v181_v57, %v199_v61 }
 0x11f   :  { %v368_v28 = vmul.f32 %v332_v26, %v332_v26  ;;  %v369_v29 = vmul.f32 %v333_v27, %v333_v27  ;;  %v212_v54 = vsub.f32 %v176_v40, %v194_v41  ;;  %v206_v25 = vld [vmem:[#allocation2 + $0x78] sm:$0xff]  ;;  %v189_v26 = vld [vmem:[#allocation2 + $0x82] sm:$0xff] }
 0x120   :  { %v298_v30 = vpop.permute.xlu1 %297  ;;  %v207_v27 = vld [vmem:[#allocation2 + $0x80] sm:$0xff]  ;;  %v224_v41 = vsub.f32 %v188_v19, %v206_v25  ;;  %v343_v43 = vmul.f32 %v217_v24, %v217_v24 }
 0x121   :  { %v334_v31 = vsub.f32 %v878_v42, %v298_v30  ;;  %419 = vrot.lane.b32.xlu1 %v368_v28, %s763_s20  ;;  %421 = vrot.lane.b32.xlu0 %v369_v29, %s763_s20  ;;  %v196_v42 = vld [vmem:[#allocation2 + $0x28] sm:$0x3]  ;;  %v338_v10 = vmul.f32 %v212_v54, %v212_v54  ;;  %v218_v30 = vsub.f32 %v182_v62, %v200_v63 }
 0x122   :  { %v214_v58 = vsub.f32 %v178_v44, %v196_v42  ;;  %v225_v44 = vsub.f32 %v189_v26, %v207_v27  ;;  %v924_v54 = vmul.f32 %v223_v38, %v223_v38  ;;  %v927_v57 = vmul.f32 %v224_v41, %v224_v41 }
 0x123   :  { %v370_v32 = vmul.f32 %v334_v31, %v334_v31  ;;  %v219_v31 = vsub.f32 %v183_v3, %v201_v4 }
 0x124   :  { %v340_v21 = vmul.f32 %v214_v58, %v214_v58  ;;  %v931_v58 = vmul.f32 %v225_v44, %v225_v44 }
 0x125   :  { %423 = vrot.lane.b32.xlu1 %v370_v32, %s763_s20  ;;  %v208_v32 = vld [vmem:[#allocation2 + $0x88] sm:$0x3]  ;;  %v345_v48 = vmul.f32 %v219_v31, %v219_v31 }
 0x126   :  { %v226_v45 = vsub.f32 %v190_v20, %v208_v32 }
 0x128   :  { %v933_v59 = vmul.f32 %v226_v45, %v226_v45 }
 0x173   :  { %v390_v53 = vpop.permute.xlu0 %389 }
 0x174   :  { %v443_v55 = vadd.f32 %v390_v53, %v335_v47  ;;  %v344_v47 = vmul.f32 %v218_v30, %v218_v30  ;;  %v922_v53 = vmul.f32 %v222_v37, %v222_v37 }
 0x176   :  { %v905_v0 = vadd.f32 1e-06, %v443_v55 }
 0x177   :  { %v392_v8 = vpop.permute.xlu1 %391  ;;  %v394_v9 = vpop.permute.xlu0 %393 }
 0x178   :  { %715 = vrsqrt.f32 %v905_v0  ;;  %v444_v14 = vadd.f32 %v392_v8, %v336_v1  ;;  %v445_v15 = vadd.f32 %v394_v9, %v337_v2  ;;  %vm481_vm6 = vcmp.eq.f32.partialorder %v905_v0, inf }
 0x179   :  { %vm483_vm7 = vcmp.eq.f32.partialorder %v905_v0, 0.0  ;;  %v484_v63 = vand.u32 2147483648, %v905_v0 }
 0x17a   :  { %v908_v28 = vadd.f32 1e-06, %v444_v14  ;;  %v910_v29 = vadd.f32 1e-06, %v445_v15 }
 0x17b   :  { %v396_v33 = vpop.permute.xlu1 %395  ;;  %v398_v34 = vpop.permute.xlu0 %397 }
 0x17c   :  { %717 = vrsqrt.f32 %v908_v28  ;;  %v446_v39 = vadd.f32 %v396_v33, %v338_v10  ;;  %v447_v40 = vadd.f32 %v398_v34, %v339_v16  ;;  %vm488_vm8 = vcmp.eq.f32.partialorder %v908_v28, inf }
 0x17d   :  { %719 = vrsqrt.f32 %v910_v29  ;;  %vm490_vm9 = vcmp.eq.f32.partialorder %v908_v28, 0.0  ;;  %v491_v4 = vand.u32 2147483648, %v908_v28  ;;  %vm495_vm10 = vcmp.eq.f32.partialorder %v910_v29, inf }
 0x17e   :  { %v914_v42 = vadd.f32 1e-06, %v446_v39  ;;  %v916_v46 = vadd.f32 1e-06, %v447_v40  ;;  %vm497_vm11 = vcmp.eq.f32.partialorder %v910_v29, 0.0  ;;  %v498_v8 = vand.u32 2147483648, %v910_v29 }
 0x17f   :  { %v400_v49 = vpop.permute.xlu1 %399  ;;  %v402_v50 = vpop.permute.xlu0 %401 }
 0x180   :  { %721 = vrsqrt.f32 %v914_v42  ;;  %v448_v55 = vadd.f32 %v400_v49, %v340_v21  ;;  %v449_v56 = vadd.f32 %v402_v50, %v341_v22  ;;  %vm502_vm12 = vcmp.eq.f32.partialorder %v914_v42, inf }
 0x181   :  { %723 = vrsqrt.f32 %v916_v46  ;;  %vm504_vm13 = vcmp.eq.f32.partialorder %v914_v42, 0.0  ;;  %v505_v17 = vand.u32 2147483648, %v914_v42  ;;  %vm509_vm14 = vcmp.eq.f32.partialorder %v916_v46, inf }
 0x182   :  { %v716_v60 = vpop.eup %715  ;;  %v935_v61 = vadd.f32 1e-06, %v448_v55  ;;  %v937_v62 = vadd.f32 1e-06, %v449_v56  ;;  %vm511_vm15 = vcmp.eq.f32.partialorder %v916_v46, 0.0  ;;  %v512_v21 = vand.u32 2147483648, %v916_v46 }
 0x183   :  { %v404_v1 = vpop.permute.xlu1 %403  ;;  %v406_v2 = vpop.permute.xlu0 %405  ;;  %v480_v3 = vmul.f32 %v716_v60, %v905_v0 }
 0x184   :  { %725 = vrsqrt.f32 %v935_v61  ;;  %v450_v5 = vadd.f32 %v404_v1, %v342_v23  ;;  %v451_v6 = vadd.f32 %v406_v2, %v343_v43  ;;  %vm516_vm0 = vcmp.eq.f32.partialorder %v935_v61, inf }
 0x185   :  { %727 = vrsqrt.f32 %v937_v62  ;;  %v482_v7 = vsel %vm481_vm6, %v905_v0, %v480_v3  ;;  %vm518_vm1 = vcmp.eq.f32.partialorder %v935_v61, 0.0  ;;  %v519_v36 = vand.u32 2147483648, %v935_v61 }
 0x186   :  { %v718_v9 = vpop.eup %717  ;;  %v953_v10 = vadd.f32 1e-06, %v450_v5  ;;  %v955_v11 = vadd.f32 1e-06, %v451_v6  ;;  %v485_v12 = vsel %vm483_vm7, %v484_v63, %v482_v7  ;;  %vm523_vm2 = vcmp.eq.f32.partialorder %v937_v62, inf }
 0x187   :  { %v720_v13 = vpop.eup %719  ;;  %v408_v14 = vpop.permute.xlu1 %407  ;;  %623 = vrot.lane.b32.xlu0 %v485_v12, %s763_s20  ;;  %v487_v16 = vmul.f32 %v718_v9, %v908_v28  ;;  %vm525_vm3 = vcmp.eq.f32.partialorder %v937_v62, 0.0  ;;  %v526_v49 = vand.u32 2147483648, %v937_v62 }
 0x188   :  { %v410_v15 = vpop.permute.xlu0 %409  ;;  %729 = vrsqrt.f32 %v953_v10  ;;  %v452_v18 = vadd.f32 %v408_v14, %v344_v47  ;;  %v494_v19 = vmul.f32 %v720_v13, %v910_v29  ;;  %vm530_vm4 = vcmp.eq.f32.partialorder %v953_v10, inf }
 0x189   :  { %v453_v0 = vadd.f32 %v410_v15, %v345_v48  ;;  %731 = vrsqrt.f32 %v955_v11  ;;  %v489_v20 = vsel %vm488_vm8, %v908_v28, %v487_v16  ;;  %vm532_vm5 = vcmp.eq.f32.partialorder %v953_v10, 0.0 }
 0x18a   :  { %v722_v22 = vpop.eup %721  ;;  %v973_v23 = vadd.f32 1e-06, %v452_v18  ;;  %v492_v25 = vsel %vm490_vm9, %v491_v4, %v489_v20  ;;  %v496_v26 = vsel %vm495_vm10, %v910_v29, %v494_v19  ;;  %v533_v4 = vand.u32 2147483648, %v953_v10 }
 0x18b   :  { %v975_v24 = vadd.f32 1e-06, %v453_v0  ;;  %v724_v27 = vpop.eup %723  ;;  %v412_v30 = vpop.permute.xlu1 %411  ;;  %625 = vrot.lane.b32.xlu1 %v492_v25, %s763_s20  ;;  %v499_v32 = vsel %vm497_vm11, %v498_v8, %v496_v26  ;;  %v501_v33 = vmul.f32 %v722_v22, %v914_v42  ;;  %vm537_vm6 = vcmp.eq.f32.partialorder %v955_v11, inf }
 0x18c   :  { %v414_v31 = vpop.permute.xlu0 %413  ;;  %733 = vrsqrt.f32 %v973_v23  ;;  %v454_v28 = vadd.f32 %v412_v30, %v918_v51  ;;  %627 = vrot.lane.b32.xlu0 %v499_v32, %s763_s20  ;;  %v508_v35 = vmul.f32 %v724_v27, %v916_v46  ;;  %vm539_vm7 = vcmp.eq.f32.partialorder %v955_v11, 0.0 }
 0x18d   :  { %v455_v34 = vadd.f32 %v414_v31, %v920_v52  ;;  %735 = vrsqrt.f32 %v975_v24  ;;  %v503_v29 = vsel %vm502_vm12, %v914_v42, %v501_v33  ;;  %v540_v7 = vand.u32 2147483648, %v955_v11 }
 0x18e   :  { %v726_v37 = vpop.eup %725  ;;  %v999_v38 = vadd.f32 1e-06, %v454_v28  ;;  %v506_v40 = vsel %vm504_vm13, %v505_v17, %v503_v29  ;;  %v510_v41 = vsel %vm509_vm14, %v916_v46, %v508_v35  ;;  %vm544_vm8 = vcmp.eq.f32.partialorder %v973_v23, inf }
 0x18f   :  { %v1001_v39 = vadd.f32 1e-06, %v455_v34  ;;  %v728_v43 = vpop.eup %727  ;;  %v416_v44 = vpop.permute.xlu1 %415  ;;  %629 = vrot.lane.b32.xlu1 %v506_v40, %s763_s20  ;;  %v513_v47 = vsel %vm511_vm15, %v512_v21, %v510_v41  ;;  %v515_v48 = vmul.f32 %v726_v37, %v935_v61  ;;  %vm546_vm9 = vcmp.eq.f32.partialorder %v973_v23, 0.0 }
 0x190   :  { %v418_v45 = vpop.permute.xlu0 %417  ;;  %737 = vrsqrt.f32 %v999_v38  ;;  %v456_v42 = vadd.f32 %v416_v44, %v922_v53  ;;  %631 = vrot.lane.b32.xlu0 %v513_v47, %s763_s20  ;;  %v522_v51 = vmul.f32 %v728_v43, %v937_v62  ;;  %vm551_vm10 = vcmp.eq.f32.partialorder %v975_v24, inf }
 0x191   :  { %v457_v50 = vadd.f32 %v418_v45, %v924_v54  ;;  %739 = vrsqrt.f32 %v1001_v39  ;;  %v517_v46 = vsel %vm516_vm0, %v935_v61, %v515_v48  ;;  %v554_v0 = vand.u32 2147483648, %v975_v24 }
 0x192   :  { %v730_v52 = vpop.eup %729  ;;  %v1025_v55 = vadd.f32 1e-06, %v456_v42  ;;  %v520_v54 = vsel %vm518_vm1, %v519_v36, %v517_v46  ;;  %v524_v56 = vsel %vm523_vm2, %v937_v62, %v522_v51  ;;  %vm553_vm11 = vcmp.eq.f32.partialorder %v975_v24, 0.0 }
 0x193   :  { %v1027_v53 = vadd.f32 1e-06, %v457_v50  ;;  %v732_v60 = vpop.eup %731  ;;  %v420_v63 = vpop.permute.xlu1 %419  ;;  %633 = vrot.lane.b32.xlu1 %v520_v54, %s763_s20  ;;  %v527_v2 = vsel %vm525_vm3, %v526_v49, %v524_v56  ;;  %v529_v3 = vmul.f32 %v730_v52, %v953_v10  ;;  %vm558_vm12 = vcmp.eq.f32.partialorder %v999_v38, inf }
 0x194   :  { %v422_v1 = vpop.permute.xlu0 %421  ;;  %741 = vrsqrt.f32 %v1025_v55  ;;  %v458_v61 = vadd.f32 %v420_v63, %v927_v57  ;;  %635 = vrot.lane.b32.xlu0 %v527_v2, %s763_s20  ;;  %v536_v6 = vmul.f32 %v732_v60, %v955_v11  ;;  %vm560_vm13 = vcmp.eq.f32.partialorder %v999_v38, 0.0 }
 0x195   :  { %v459_v5 = vadd.f32 %v422_v1, %v931_v58  ;;  %743 = vrsqrt.f32 %v1027_v53  ;;  %v531_v62 = vsel %vm530_vm4, %v953_v10, %v529_v3  ;;  %v547_v10 = vand.u32 2147483648, %v973_v23 }
 0x196   :  { %v734_v8 = vpop.eup %733  ;;  %v1051_v9 = vadd.f32 1e-06, %v458_v61  ;;  %v534_v58 = vsel %vm532_vm5, %v533_v4, %v531_v62  ;;  %v538_v12 = vsel %vm537_vm6, %v955_v11, %v536_v6  ;;  %vm565_vm14 = vcmp.eq.f32.partialorder %v1001_v39, inf }
 0x197   :  { %v1053_v57 = vadd.f32 1e-06, %v459_v5  ;;  %v736_v13 = vpop.eup %735  ;;  %v424_v14 = vpop.permute.xlu1 %423  ;;  %637 = vrot.lane.b32.xlu1 %v534_v58, %s763_s20  ;;  %v541_v15 = vsel %vm539_vm7, %v540_v7, %v538_v12  ;;  %v543_v16 = vmul.f32 %v734_v8, %v973_v23  ;;  %vm567_vm15 = vcmp.eq.f32.partialorder %v1001_v39, 0.0 }
 0x198   :  { %745 = vrsqrt.f32 %v1051_v9  ;;  %v460_v17 = vadd.f32 %v424_v14, %v933_v59  ;;  %639 = vrot.lane.b32.xlu0 %v541_v15, %s763_s20  ;;  %v550_v11 = vmul.f32 %v736_v13, %v975_v24  ;;  %vm572_vm0 = vcmp.eq.f32.partialorder %v1025_v55, inf }
 0x199   :  { %747 = vrsqrt.f32 %v1053_v57  ;;  %v545_v18 = vsel %vm544_vm8, %v973_v23, %v543_v16  ;;  %v561_v23 = vand.u32 2147483648, %v999_v38  ;;  %v575_v29 = vand.u32 2147483648, %v1025_v55 }
 0x19a   :  { %v738_v19 = vpop.eup %737  ;;  %v1071_v20 = vadd.f32 1e-06, %v460_v17  ;;  %v548_v21 = vsel %vm546_vm9, %v547_v10, %v545_v18  ;;  %v552_v59 = vsel %vm551_vm10, %v975_v24, %v550_v11  ;;  %v568_v24 = vand.u32 2147483648, %v1001_v39 }
 0x19b   :  { %v740_v22 = vpop.eup %739  ;;  %641 = vrot.lane.b32.xlu1 %v548_v21, %s763_s20  ;;  %v555_v25 = vsel %vm553_vm11, %v554_v0, %v552_v59  ;;  %v557_v26 = vmul.f32 %v738_v19, %v999_v38  ;;  %vm574_vm1 = vcmp.eq.f32.partialorder %v1025_v55, 0.0  ;;  %vm579_vm2 = vcmp.eq.f32.partialorder %v1027_v53, inf }
 0x19c   :  { %749 = vrsqrt.f32 %v1071_v20  ;;  %643 = vrot.lane.b32.xlu0 %v555_v25, %s763_s20  ;;  %v564_v27 = vmul.f32 %v740_v22, %v1001_v39  ;;  %vm581_vm3 = vcmp.eq.f32.partialorder %v1027_v53, 0.0  ;;  %vm586_vm4 = vcmp.eq.f32.partialorder %v1051_v9, inf }
 0x19d   :  { %v559_v30 = vsel %vm558_vm12, %v999_v38, %v557_v26  ;;  %v582_v38 = vand.u32 2147483648, %v1027_v53  ;;  %v589_v47 = vand.u32 2147483648, %v1051_v9  ;;  %vm588_vm5 = vcmp.eq.f32.partialorder %v1051_v9, 0.0 }
 0x19e   :  { %v742_v31 = vpop.eup %741  ;;  %v562_v32 = vsel %vm560_vm13, %v561_v23, %v559_v30  ;;  %v566_v33 = vsel %vm565_vm14, %v1001_v39, %v564_v27  ;;  %vm593_vm6 = vcmp.eq.f32.partialorder %v1053_v57, inf  ;;  %v596_v42 = vand.u32 2147483648, %v1053_v57 }
 0x19f   :  { %v744_v28 = vpop.eup %743  ;;  %645 = vrot.lane.b32.xlu1 %v562_v32, %s763_s20  ;;  %v569_v34 = vsel %vm567_vm15, %v568_v24, %v566_v33  ;;  %v571_v35 = vmul.f32 %v742_v31, %v1025_v55  ;;  %vm595_vm7 = vcmp.eq.f32.partialorder %v1053_v57, 0.0  ;;  %vm600_vm8 = vcmp.eq.f32.partialorder %v1071_v20, inf }
 0x1a0   :  { %647 = vrot.lane.b32.xlu0 %v569_v34, %s763_s20  ;;  %v578_v36 = vmul.f32 %v744_v28, %v1027_v53  ;;  %vm602_vm9 = vcmp.eq.f32.partialorder %v1071_v20, 0.0  ;;  %vm677_vm10 = vcmask 146432   ;;  %vm680_vm11 = vcmask 140288  }
 0x1a1   :  { %v573_v37 = vsel %vm572_vm0, %v1025_v55, %v571_v35 }
 0x1a2   :  { %v746_v39 = vpop.eup %745  ;;  %v576_v40 = vsel %vm574_vm1, %v575_v29, %v573_v37  ;;  %v580_v41 = vsel %vm579_vm2, %v1027_v53, %v578_v36  ;;  %v603_v53 = vand.u32 2147483648, %v1071_v20 }
 0x1a3   :  { %v748_v43 = vpop.eup %747  ;;  %649 = vrot.lane.b32.xlu1 %v576_v40, %s763_s20  ;;  %v583_v44 = vsel %vm581_vm3, %v582_v38, %v580_v41  ;;  %v585_v45 = vmul.f32 %v746_v39, %v1051_v9 }
 0x1a4   :  { %651 = vrot.lane.b32.xlu0 %v583_v44, %s763_s20  ;;  %v592_v48 = vmul.f32 %v748_v43, %v1053_v57 }
 0x1a5   :  { %v587_v49 = vsel %vm586_vm4, %v1051_v9, %v585_v45 }
 0x1a6   :  { %v750_v50 = vpop.eup %749  ;;  %v590_v51 = vsel %vm588_vm5, %v589_v47, %v587_v49  ;;  %v594_v46 = vsel %vm593_vm6, %v1053_v57, %v592_v48 }
 0x1a7   :  { %653 = vrot.lane.b32.xlu1 %v590_v51, %s763_s20  ;;  %v597_v52 = vsel %vm595_vm7, %v596_v42, %v594_v46  ;;  %v599_v55 = vmul.f32 %v750_v50, %v1071_v20 }
 0x1a8   :  { %655 = vrot.lane.b32.xlu0 %v597_v52, %s763_s20 }
 0x1a9   :  { %v601_v54 = vsel %vm600_vm8, %v1071_v20, %v599_v55 }
 0x1aa   :  { %v604_v56 = vsel %vm602_vm9, %v603_v53, %v601_v54 }
 0x1ab   :  { %657 = vrot.lane.b32.xlu1 %v604_v56, %s763_s20 }
 0x1f9   :  { %v624_v60 = vpop.permute.xlu0 %623 }
 0x1fa   :  { %678 = vst.msk [vmem:[%s1193_s1] sm:$0xff] %vm677_vm10, %v624_v60 }
 0x1fd   :  { %v626_v63 = vpop.permute.xlu1 %625 }
 0x1fe   :  { %679 = vst.msk [vmem:[%s1193_s1 + $0x8] sm:$0xff] %vm677_vm10, %v626_v63  ;;  %v628_v1 = vpop.permute.xlu0 %627 }
 0x1ff   :  { %681 = vst.msk [vmem:[%s1193_s1 + $0x10] sm:$0x3] %vm680_vm11, %v628_v1 }
 0x201   :  { %v630_v2 = vpop.permute.xlu1 %629 }
 0x202   :  { %682 = vst.msk [vmem:[%s1193_s1 + $0x18] sm:$0xff] %vm677_vm10, %v630_v2  ;;  %v632_v3 = vpop.permute.xlu0 %631 }
 0x203   :  { %683 = vst.msk [vmem:[%s1193_s1 + $0x20] sm:$0xff] %vm677_vm10, %v632_v3 }
 0x205   :  { %v634_v4 = vpop.permute.xlu1 %633 }
 0x206   :  { %684 = vst.msk [vmem:[%s1193_s1 + $0x28] sm:$0x3] %vm680_vm11, %v634_v4  ;;  %v636_v61 = vpop.permute.xlu0 %635 }
 0x207   :  { %685 = vst.msk [vmem:[%s1193_s1 + $0x30] sm:$0xff] %vm677_vm10, %v636_v61 }
 0x209   :  { %v638_v5 = vpop.permute.xlu1 %637 }
 0x20a   :  { %686 = vst.msk [vmem:[%s1193_s1 + $0x38] sm:$0xff] %vm677_vm10, %v638_v5  ;;  %v640_v6 = vpop.permute.xlu0 %639 }
 0x20b   :  { %687 = vst.msk [vmem:[%s1193_s1 + $0x40] sm:$0x3] %vm680_vm11, %v640_v6 }
 0x20d   :  { %v642_v62 = vpop.permute.xlu1 %641 }
 0x20e   :  { %688 = vst.msk [vmem:[%s1193_s1 + $0x48] sm:$0xff] %vm677_vm10, %v642_v62  ;;  %v644_v7 = vpop.permute.xlu0 %643 }
 0x20f   :  { %689 = vst.msk [vmem:[%s1193_s1 + $0x50] sm:$0xff] %vm677_vm10, %v644_v7 }
 0x211   :  { %v646_v8 = vpop.permute.xlu1 %645 }
 0x212   :  { %690 = vst.msk [vmem:[%s1193_s1 + $0x58] sm:$0x3] %vm680_vm11, %v646_v8  ;;  %v648_v9 = vpop.permute.xlu0 %647 }
 0x213   :  { %691 = vst.msk [vmem:[%s1193_s1 + $0x60] sm:$0xff] %vm677_vm10, %v648_v9 }
 0x215   :  { %v650_v57 = vpop.permute.xlu1 %649 }
 0x216   :  { %692 = vst.msk [vmem:[%s1193_s1 + $0x68] sm:$0xff] %vm677_vm10, %v650_v57  ;;  %v652_v58 = vpop.permute.xlu0 %651 }
 0x217   :  { %693 = vst.msk [vmem:[%s1193_s1 + $0x70] sm:$0x3] %vm680_vm11, %v652_v58 }
 0x219   :  { %v654_v12 = vpop.permute.xlu1 %653 }
 0x21a   :  { %694 = vst.msk [vmem:[%s1193_s1 + $0x78] sm:$0xff] %vm677_vm10, %v654_v12  ;;  %v656_v13 = vpop.permute.xlu0 %655 }
 0x21b   :  { %695 = vst.msk [vmem:[%s1193_s1 + $0x80] sm:$0xff] %vm677_vm10, %v656_v13 }
 0x21d   :  { %v658_v14 = vpop.permute.xlu1 %657 }
 0x21e   :  { %696 = vst.msk [vmem:[%s1193_s1 + $0x88] sm:$0x3] %vm680_vm11, %v658_v14 }
 0x21f   :  { %701 = vsyncpa [#allocation4], 1 }

</bundles_post_ra>
